<compile_context>
chip_gen: v7x
topology: tpu7x:2x2x1
jax: 0.10.0
libtpu: 0.0.40
codegen_flags: <defaults>
</compile_context>

<pallas_src>
import jax
import jax.numpy as jnp
import numpy as np
from jax.experimental import pallas as pl
from jax.experimental.pallas import tpu as pltpu

KH = KW = 3   # fixed 3x3 kernel, as in nn.Conv2d(input_channels, 32, 3)
COUT = 32


def _round_up(a, b):
    return (a + b - 1) // b * b


def _gemm_bias_relu_kernel(lhs_ref, band_ref, bias_ref, o_ref):
    """One grid step = one tile of M = N*OH output rows.

    lhs_ref  : (m_tile, K)    K  = KH*Cin*W   (the 3 input rows feeding an output row)
    band_ref : (K, Nl)        Nl = OW*Cout    (banded conv weights)
    bias_ref : (1, Nl)
    o_ref    : (m_tile, Nl)   lane-dense output slab
    """
    acc = jnp.dot(lhs_ref[...], band_ref[...], preferred_element_type=jnp.float32)
    acc = acc + bias_ref[...]                       # (1, Nl) broadcasts over rows
    o_ref[...] = jnp.maximum(acc, 0.0).astype(o_ref.dtype)


def _build_banded_weight(w_oihw, W):
    """(Cout, Cin, KH, KW) -> (KH*Cin*W, OW*Cout) banded matrix.

    band[(kh*Cin+ci)*W + w_in, ow*Cout + co] = w[co, ci, kh, w_in-ow] for
    0 <= w_in-ow < KW, else 0.  Pure weight placement (no conv math).
    """
    Cout, Cin, _, _ = w_oihw.shape
    OW = W - KW + 1
    taps = jnp.transpose(w_oihw, (2, 1, 3, 0)).astype(jnp.float32)  # (KH, Cin, KW, Cout)
    band = jnp.zeros((KH, Cin, W, OW, Cout), jnp.float32)
    for kw in range(KW):
        shift = jnp.eye(W, OW, k=-kw, dtype=jnp.float32)            # 1 at [ow+kw, ow]
        band = band + jnp.einsum("wo,hcd->hcwod", shift, taps[:, :, kw, :])
    return band.reshape(KH * Cin * W, OW * Cout)


@jax.jit
def front_forward(x_nchw, w_oihw, bias):
    """Forward pass of `front` (conv1 3x3 valid, stride 1, + ReLU).

    x_nchw : (N, Cin, H, W)   float32   -- PyTorch NCHW layout
    w_oihw : (Cout, Cin, 3, 3) float32  -- PyTorch Conv2d weight layout
    bias   : (Cout,) float32
    returns: (N, Cout, OH, OW) float32  -- PyTorch NCHW layout
    """
    N, Cin, H, W = x_nchw.shape
    Cout = w_oihw.shape[0]
    OH, OW = H - KH + 1, W - KW + 1

    # ---- layout prep (glue only, no conv math) ------------------------------
    x_rows = jnp.transpose(x_nchw, (0, 2, 1, 3)).astype(jnp.float32)   # (N, H, Cin, W)
    # For each output row oh, gather its KH input rows -> contraction dim K.
    lhs = jnp.stack([x_rows[:, kh:kh + OH] for kh in range(KH)], axis=2)  # (N, OH, KH, Cin, W)
    K = KH * Cin * W
    lhs = lhs.reshape(N * OH, K)

    band = _build_banded_weight(w_oihw, W)                              # (K, OW*Cout)
    Nl = OW * Cout
    bias_t = jnp.tile(bias.astype(jnp.float32), OW).reshape(1, Nl)      # lane j=ow*Cout+co -> bias[co]

    # ---- M tiling: large blocks (amortize per-step overhead), >=2 steps (v7x) ----
    M = N * OH
    if M <= 8:
        m_tile = M
    else:
        m_tile = min(512, _round_up(pl.cdiv(M, 2), 8))
    grid_m = pl.cdiv(M, m_tile)
    M_pad = grid_m * m_tile
    if M_pad != M:
        lhs = jnp.pad(lhs, ((0, M_pad - M), (0, 0)))

    out = pl.pallas_call(
        _gemm_bias_relu_kernel,
        out_shape=jax.ShapeDtypeStruct((M_pad, Nl), jnp.float32),
        grid_spec=pltpu.PrefetchScalarGridSpec(
            num_scalar_prefetch=0,
            grid=(grid_m,),
            in_specs=[
                pl.BlockSpec((m_tile, K), lambda i: (i, 0)),
                pl.BlockSpec((K, Nl), lambda i: (0, 0)),
                pl.BlockSpec((1, Nl), lambda i: (0, 0)),
            ],
            out_specs=pl.BlockSpec((m_tile, Nl), lambda i: (i, 0)),
        ),
        compiler_params=pltpu.CompilerParams(
            dimension_semantics=("parallel",),
        ),
    )(lhs, band, bias_t)

    out = out[:M].reshape(N, OH, OW, Cout)          # free: split of contiguous dims
    # Torch parity requires NCHW; an NHWC-friendly consumer can skip this transpose.
    return jnp.transpose(out, (0, 3, 1, 2))


def _reference_forward(x_nchw, w_oihw, bias):
    """Plain-JAX reference (matches torch.nn.functional.conv2d + relu)."""
    out = jax.lax.conv_general_dilated(
        x_nchw, w_oihw,
        window_strides=(1, 1), padding="VALID",
        dimension_numbers=("NCHW", "OIHW", "NCHW"),
    )
    out = out + bias[None, :, None, None]
    return jnp.maximum(out, 0.0)


if __name__ == "__main__":
    def _init(key, N, Cin, H, W, Cout=COUT):
        kx, kw, kb = jax.random.split(key, 3)
        x = jax.random.normal(kx, (N, Cin, H, W), dtype=jnp.float32)
        fan_in = Cin * KH * KW
        bound = 1.0 / np.sqrt(fan_in)
        w = jax.random.uniform(kw, (Cout, Cin, KH, KW),
                               minval=-bound, maxval=bound, dtype=jnp.float32)
        b = jax.random.uniform(kb, (Cout,),
                               minval=-bound, maxval=bound, dtype=jnp.float32)
        return x, w, b

    # MNIST-like: batch=2, 1 input channel, 16x16 spatial.
    x, w, b = _init(jax.random.PRNGKey(0), N=2, Cin=1, H=16, W=16)
    out = jax.block_until_ready(front_forward(x, w, b))
    ref = jax.block_until_ready(_reference_forward(x, w, b))
    assert out.shape == (2, COUT, 14, 14), out.shape
    np.testing.assert_allclose(np.asarray(out), np.asarray(ref), atol=1e-4, rtol=1e-4)

    # Multi-channel config to exercise the general Cin > 1 path.
    x2, w2, b2 = _init(jax.random.PRNGKey(1), N=3, Cin=4, H=12, W=12)
    out2 = jax.block_until_ready(front_forward(x2, w2, b2))
    ref2 = jax.block_until_ready(_reference_forward(x2, w2, b2))
    np.testing.assert_allclose(np.asarray(out2), np.asarray(ref2), atol=1e-4, rtol=1e-4)

    print("KERNEL_OK")
</pallas_src>

<mosaic_0001>
module attributes {stable_mosaic.version = 11 : i64} {
  func.func @_gemm_bias_relu_kernel(%arg0: i32, %arg1: memref<16x48xf32, #tpu.memory_space<vmem>>, %arg2: memref<48x448xf32, #tpu.memory_space<vmem>>, %arg3: memref<1x448xf32, #tpu.memory_space<vmem>>, %arg4: memref<16x448xf32, #tpu.memory_space<vmem>>) attributes {dimension_semantics = [#tpu.dimension_semantics<parallel>], iteration_bounds = array<i64: 2>, scalar_prefetch = 0 : i64, scratch_operands = 0 : i64, tpu.core_type = #tpu.core_type<tc>, window_params = [{transform_indices = @transform_0, window_bounds = array<i64: 16, 48>}, {pipeline_mode = #tpu.pipeline_mode<synchronous>, transform_indices = @transform_1, window_bounds = array<i64: 48, 448>}, {pipeline_mode = #tpu.pipeline_mode<synchronous>, transform_indices = @transform_2, window_bounds = array<i64: 1, 448>}, {transform_indices = @transform_3, window_bounds = array<i64: 16, 448>}]} {
    %c0 = arith.constant 0 : index
    %c0_0 = arith.constant 0 : index
    %0 = vector.load %arg1[%c0, %c0_0] : memref<16x48xf32, #tpu.memory_space<vmem>>, vector<16x48xf32>
    %c0_1 = arith.constant 0 : index
    %c0_2 = arith.constant 0 : index
    %1 = vector.load %arg2[%c0_1, %c0_2] : memref<48x448xf32, #tpu.memory_space<vmem>>, vector<48x448xf32>
    %cst = arith.constant dense<0.000000e+00> : vector<16x448xf32>
    %2 = tpu.matmul %0, %1, %cst {dimension_numbers = #tpu.dot_dimension_numbers<[1], [0], [0], [1], [0, 0, 1, 1], [], []>} : vector<16x48xf32>, vector<48x448xf32>, vector<16x448xf32> -> vector<16x448xf32>
    %c0_3 = arith.constant 0 : index
    %c0_4 = arith.constant 0 : index
    %3 = vector.load %arg3[%c0_3, %c0_4] : memref<1x448xf32, #tpu.memory_space<vmem>>, vector<1x448xf32>
    %4 = vector.broadcast %3 : vector<1x448xf32> to vector<16x448xf32>
    %5 = arith.addf %2, %4 : vector<16x448xf32>
    %cst_5 = arith.constant 0.000000e+00 : f32
    %6 = vector.broadcast %cst_5 : f32 to vector<16x448xf32>
    %7 = arith.maximumf %5, %6 : vector<16x448xf32>
    %c0_6 = arith.constant 0 : index
    %c0_7 = arith.constant 0 : index
    %8 = vector.load %arg4[%c0_6, %c0_7] : memref<16x448xf32, #tpu.memory_space<vmem>>, vector<16x448xf32>
    tpu.vector_store %arg4[%c0_6, %c0_7], %7 {strides = array<i32>} : memref<16x448xf32, #tpu.memory_space<vmem>>, vector<16x448xf32>,
    return
  }
  func.func @transform_0(%arg0: i32) -> (i32, i32) {
    %c0_i32 = arith.constant 0 : i32
    %c0_i32_0 = arith.constant 0 : i32
    return %arg0, %c0_i32 : i32, i32
  }
  func.func @transform_1(%arg0: i32) -> (i32, i32) {
    %c0_i32 = arith.constant 0 : i32
    %c0_i32_0 = arith.constant 0 : i32
    %c0_i32_1 = arith.constant 0 : i32
    return %c0_i32, %c0_i32_0 : i32, i32
  }
  func.func @transform_2(%arg0: i32) -> (i32, i32) {
    %c0_i32 = arith.constant 0 : i32
    %c0_i32_0 = arith.constant 0 : i32
    %c0_i32_1 = arith.constant 0 : i32
    return %c0_i32, %c0_i32_0 : i32, i32
  }
  func.func @transform_3(%arg0: i32) -> (i32, i32) {
    %c0_i32 = arith.constant 0 : i32
    %c0_i32_0 = arith.constant 0 : i32
    return %arg0, %c0_i32 : i32, i32
  }
}

</mosaic_0001>

<bundles_post_ra>
// kernel: tile.8
= control target key start
LH: loop header
LB: loop body
LE: loop exit
PB: predicated region body
PF: predicated region fallthrough
CT: control target
= control target key end

     0   :  { %s28_s0 = inlined_call_operand.vmem [shape: f32[32], index: 0, kind: input, shape index: {}]   ;;  %s29_s1 = inlined_call_operand.vmem [shape: f32[14,32], index: 1, kind: output, shape index: {}]  }
   0x1   :  { %v4_v0 = vld [vmem:[%s28_s0] ss:$0 sm:$0xff] }
   0x2   :  { %5 = vst [vmem:[%s29_s1] sm:$0xff] %v4_v0  ;;  %8 = vst [vmem:[%s29_s1 + $0x8] sm:$0xff] %v4_v0 }

// kernel: tile.9
= control target key start
LH: loop header
LB: loop body
LE: loop exit
PB: predicated region body
PF: predicated region fallthrough
CT: control target
= control target key end

     0   :  { %s57_s8 = smov 96   ;;  %vm3_vm0 = vcmask 261120   ;;  %s59_s15 = smov 64   ;;  %vm9_vm1 = vcmask 1048320   ;;  %vm15_vm2 = vcmask 785920   ;;  %vm21_vm3 = vcmask 523520   ;;  %s94_s0 = inlined_call_operand.vmem [shape: f32[14,32], index: 0, kind: input, shape index: {}]   ;;  %s95_s1 = inlined_call_operand.vmem [shape: f32[1,448], index: 1, kind: output, shape index: {}]  }
   0x1   :  { %v48_v0 = vld [vmem:[%s94_s0 + $0x3] ss:$4 sm:$0x7]   ;;  %v49_v1 = vld [vmem:[%s94_s0 + $0x2] ss:$4 sm:$0x7]  }
   0x2   :  { %7 = vrot.lane.b32.xlu0 %v48_v0, %s57_s8  ;;  %v50_v2 = vld [vmem:[%s94_s0 + $0x1] ss:$4 sm:$0xf]   ;;  %v2_v3 = vld [vmem:[%s94_s0] ss:$4 sm:$0xf]  }
   0x3   :  { %s58_s0 = smov 32   ;;  %4 = vst.msk [vmem:[#allocation0] ss:$8 sm:$0xf] %vm3_vm0, %v2_v3  }
   0x4   :  { %19 = vrot.lane.b32.xlu1 %v50_v2, %s58_s0 }
   0x6   :  { %13 = vrot.lane.b32.xlu0 %v49_v1, %s59_s15 }
  0x74   :  { %v8_v4 = vpop.permute.xlu0 %7  }
  0x75   :  { %10 = vst.msk [vmem:[#allocation0] ss:$8 sm:$0x7] %vm9_vm1, %v8_v4  }
  0x76   :  { %v20_v5 = vpop.permute.xlu1 %19  }
  0x78   :  { %v14_v6 = vpop.permute.xlu0 %13  }
  0x79   :  { %16 = vst.msk [vmem:[#allocation0] ss:$8 sm:$0x7] %vm15_vm2, %v14_v6  }
  0x7a   :  { %22 = vst.msk [vmem:[#allocation0] ss:$8 sm:$0xf] %vm21_vm3, %v20_v5  }
  0x81   :  { %v26_v7 = vld [vmem:[#allocation0] sm:$0x1]  ;;  %v30_v8 = vld [vmem:[#allocation0 + $0x8] sm:$0x1]  ;;  %v35_v9 = vld [vmem:[#allocation0 + $0x10] sm:$0x1] }
  0x82   :  { %28 = vst [vmem:[%s95_s1] sm:$0x1] %v26_v7  ;;  %51 = vst [vmem:[%s95_s1 + $0x1] sm:$0x1] %v30_v8  ;;  %v41_v10 = vld [vmem:[#allocation0 + $0x18] sm:$0x1] }
  0x83   :  { %52 = vst [vmem:[%s95_s1 + $0x2] sm:$0x1] %v35_v9  ;;  %53 = vst [vmem:[%s95_s1 + $0x3] sm:$0x1] %v41_v10 }

// kernel: front_forward.1
= control target key start
LH: loop header
LB: loop body
LE: loop exit
PB: predicated region body
PF: predicated region fallthrough
CT: control target
= control target key end

     0   :  { %s539_s12 = smov 0   ;;  %s637_s0 = inlined_call_operand.vmem [shape: f32[32,48], index: 0, kind: input, shape index: {}]   ;;  %s638_s1 = inlined_call_operand.vmem [shape: f32[48,448], index: 1, kind: input, shape index: {}]   ;;  %s639_s2 = inlined_call_operand.vmem [shape: f32[1,448], index: 2, kind: input, shape index: {}]   ;;  %s640_s3 = inlined_call_operand.vmem [shape: f32[32,448], index: 3, kind: output, shape index: {}]  }
   0x1 LB: > { %s460_s13 = sadd.s32 4294967295, %s516_s12   ;;  %p464_p0 = scmp.ge.s32.totalorder %s516_s12, 1  ;;  %s516_s12 = sphi %s539_s12, %s13_s12  }
   0x2   : > { %p138_p1 = scmp.lt.s32.totalorder %s516_s12, 3 }
   0x4   : > { %p139_p2 = pnand %p464_p0, %p138_p1 }
   0x5   : > { %v179_v0 = vld [vmem:[%s638_s1 + $0x8] sm:$0xff] (!%p139_p2)  ;;  %v181_v2 = vld [vmem:[%s638_s1 + $0x18] sm:$0xff] (!%p139_p2)  ;;  %s465_s20 = sshll.u32 (!%p139_p2), %s460_s13, 1  ;;  %v178_v5 = vld [vmem:[%s638_s1] sm:$0xff] (!%p139_p2)  ;;  %v518_v7 = vmov (!%p139_p2), 0.0   ;;  %vm224_vm0 = vcmask (!%p139_p2), 392192   ;;  %v204_v39 = vlaneseq (!%p139_p2) }
   0x6   : > { %142 = sbr.rel (%p139_p2) target bundleno = 244 (0xf4), region = 32  ;;  %v183_v1 = vld [vmem:[%s638_s1 + $0x28] sm:$0xff] (!%p139_p2)  ;;  %v185_v4 = vld [vmem:[%s638_s1 + $0x38] sm:$0xff] (!%p139_p2)  ;;  %v182_v6 = vld [vmem:[%s638_s1 + $0x20] sm:$0xff] (!%p139_p2)  ;;  %295 = vmatprep.mubr.f32.mxu0 (!%p139_p2), %v518_v7  ;;  %372 = vmatprep.mubr.f32.mxu1 (!%p139_p2), %v518_v7  ;;  %p164_p3 = scmp.lt.s32.totalorder (!%p139_p2), %s465_s20, 3  ;;  %vm396_vm1 = vcmask (!%p139_p2), 523264  }
   0x7   : > { %v477_v3 = vpack.c.bf16 (!%p139_p2), %v183_v1, %v179_v0  ;;  %v489_v8 = vpack.c.bf16 (!%p139_p2), %v185_v4, %v181_v2  ;;  %v479_v9 = vpack.c.bf16 (!%p139_p2), %v182_v6, %v178_v5  ;;  %v180_v10 = vld [vmem:[%s638_s1 + $0x10] sm:$0xff] (!%p139_p2)  ;;  %v187_v12 = vld [vmem:[%s638_s1 + $0x48] sm:$0xff] (!%p139_p2)  ;;  %v189_v15 = vld [vmem:[%s638_s1 + $0x58] sm:$0xff] (!%p139_p2)  ;;  %v205_v40 = vshrl.u32 (!%p139_p2), %v204_v39, 7 }
   0x8   : > { %v184_v11 = vld [vmem:[%s638_s1 + $0x30] sm:$0xff] (!%p139_p2)  ;;  %v191_v14 = vld [vmem:[%s638_s1 + $0x68] sm:$0xff] (!%p139_p2)  ;;  %v193_v16 = vld [vmem:[%s638_s1 + $0x78] sm:$0xff] (!%p139_p2) }
   0x9   : > { %478 = vmatprep.subr.bf16.mxu0 (!%p139_p2), %v477_v3  ;;  %v491_v13 = vpack.c.bf16 (!%p139_p2), %v184_v11, %v180_v10  ;;  %490 = vmatprep.subr.bf16.mxu1 (!%p139_p2), %v489_v8  ;;  %v481_v17 = vpack.c.bf16 (!%p139_p2), %v191_v14, %v187_v12  ;;  %v493_v18 = vpack.c.bf16 (!%p139_p2), %v193_v16, %v189_v15  ;;  %v186_v19 = vld [vmem:[%s638_s1 + $0x40] sm:$0xff] (!%p139_p2)  ;;  %v188_v21 = vld [vmem:[%s638_s1 + $0x50] sm:$0xff] (!%p139_p2)  ;;  %v195_v24 = vld [vmem:[%s638_s1 + $0x88] sm:$0xff] (!%p139_p2)  ;;  %v206_v41 = vsub.s32 (!%p139_p2), 0, %v205_v40 }
   0xa   : > { %480 = vmatpush1.bf16.msra.mxu0 (!%p139_p2), %v479_v9  ;;  %v190_v20 = vld [vmem:[%s638_s1 + $0x60] sm:$0xff] (!%p139_p2)  ;;  %v192_v23 = vld [vmem:[%s638_s1 + $0x70] sm:$0xff] (!%p139_p2)  ;;  %v199_v25 = vld [vmem:[%s638_s1 + $0xa8] sm:$0xff] (!%p139_p2)  ;;  %v214_v43 = vsub.s32 (!%p139_p2), 2, %v205_v40  ;;  %v210_v44 = vsub.s32 (!%p139_p2), 1, %v205_v40  ;;  %v218_v45 = vsub.s32 (!%p139_p2), 3, %v205_v40 }
   0xb   : > { %492 = vmatpush1.bf16.msra.mxu1 (!%p139_p2), %v491_v13  ;;  %v483_v22 = vpack.c.bf16 (!%p139_p2), %v190_v20, %v186_v19  ;;  %482 = vmatprep.subr.bf16.mxu0 (!%p139_p2), %v481_v17  ;;  %v495_v26 = vpack.c.bf16 (!%p139_p2), %v192_v23, %v188_v21  ;;  %v485_v27 = vpack.c.bf16 (!%p139_p2), %v199_v25, %v195_v24  ;;  %v197_v28 = vld [vmem:[%s638_s1 + $0x98] sm:$0xff] (!%p139_p2)  ;;  %v194_v30 = vld [vmem:[%s638_s1 + $0x80] sm:$0xff] (!%p139_p2)  ;;  %v196_v33 = vld [vmem:[%s638_s1 + $0x90] sm:$0xff] (!%p139_p2) }
   0xc   : > { %494 = vmatprep.subr.bf16.mxu1 (!%p139_p2), %v493_v18  ;;  %v201_v29 = vld [vmem:[%s638_s1 + $0xb8] sm:$0xff] (!%p139_p2)  ;;  %v198_v32 = vld [vmem:[%s638_s1 + $0xa0] sm:$0xff] (!%p139_p2)  ;;  %v200_v34 = vld [vmem:[%s638_s1 + $0xb0] sm:$0xff] (!%p139_p2) }
   0xd   : > { %s642_s20 = smov (!%p164_p3, %s465_s20), 3  ;;  %v497_v31 = vpack.c.bf16 %v201_v29, %v197_v28  ;;  %v487_v35 = vpack.c.bf16 %v198_v32, %v194_v30  ;;  %v499_v36 = vpack.c.bf16 %v200_v34, %v196_v33  ;;  %v202_v42 = vld [vmem:[%s639_s2] sm:$0xf] }
   0xe   : > { %s466_s5 = sshll.u32 %s642_s20, 3  ;;  %484 = vmatpush1.bf16.msra.mxu0 %v483_v22  ;;  %v207_v46 = vrot.slane %v202_v42, %v206_v41  ;;  %v215_v47 = vrot.slane %v202_v42, %v214_v43  ;;  %v211_v48 = vrot.slane %v202_v42, %v210_v44  ;;  %s476_s18 = sshll.u32 %s642_s20, 5  ;;  %v219_v49 = vrot.slane %v202_v42, %v218_v45 }
   0xf   : > { %496 = vmatpush1.bf16.msra.mxu1 %v495_v26  ;;  %486 = vmatprep.subr.bf16.mxu0 %v485_v27  ;;  %s167_s15 = scalar_lea.vmem %s637_s0, %s466_s5  ;;  %s174_s22 = scalar_lea.vmem %s640_s3, %s476_s18 }
  0x10   : > { %498 = vmatprep.subr.bf16.mxu1 %v497_v31  ;;  %v176_v37 = vld [vmem:[%s167_s15] sm:$0xff]  ;;  %v177_v38 = vld [vmem:[%s167_s15 + $0x8] sm:$0xff] }
  0x12   : > { %488 = vmatpush1.bf16.msra.mxu0 %v487_v35 }
  0x13   : > { %500 = vmatpush1.bf16.msra.mxu1 %v499_v36 }
  0x15   : > { %470 = vmatmul.mubr.msk.f32.vlgmr.msra.gmra.mrb[0].mxu0 %vm224_vm0, %v176_v37 }
  0x16   : > { %472 = vmatmul.mubr.msk.f32.vlgmr.msra.gmra.mrb[0].mxu1 %vm224_vm0, %v176_v37  ;;  %301 = vmatprep.mubr.f32.mxu0 %v518_v7 }
  0x17   : > { %378 = vmatprep.mubr.f32.mxu1 %v518_v7 }
  0x19   : > { %471 = vmatmul.mubr.msk.f32.gmra.mrb[2].mxu0 %vm224_vm0, %v177_v38 }
  0x1a   : > { %473 = vmatmul.mubr.msk.f32.gmra.mrb[2].mxu1 %vm224_vm0, %v177_v38 }
  0xe8   : > { %v297_v50 = vpop.f32.mrb[0].mxu0 }
  0xe9   : > { %v298_v51 = vadd.f32 %v297_v50, %v207_v46  ;;  %v374_v52 = vpop.f32.mrb[0].mxu1  ;;  %v299_v53 = vpop.f32.mrb[1].mxu0 }
  0xea   : > { %v375_v54 = vadd.f32 %v374_v52, %v215_v47  ;;  %v300_v55 = vadd.f32 %v299_v53, %v211_v48  ;;  %v376_v56 = vpop.f32.mrb[1].mxu1 }
  0xeb   : > { %v385_v57 = vmax.f32 %v298_v51, 0.0  ;;  %v377_v58 = vadd.f32 %v376_v56, %v219_v49 }
  0xec   : > { %v387_v59 = vmax.f32 %v375_v54, 0.0  ;;  %v386_v60 = vmax.f32 %v300_v55, 0.0  ;;  %v303_v61 = vpop.f32.mrb[2].mxu0 }
  0xed   : > { %393 = vst [vmem:[%s174_s22] sm:$0xff] %v385_v57  ;;  %v388_v62 = vmax.f32 %v377_v58, 0.0  ;;  %v304_v63 = vadd.f32 %v303_v61, %v207_v46  ;;  %v380_v0 = vpop.f32.mrb[2].mxu1  ;;  %v305_v1 = vpop.f32.mrb[3].mxu0 }
  0xee   : > { %395 = vst [vmem:[%s174_s22 + $0x10] sm:$0xff] %v387_v59  ;;  %394 = vst [vmem:[%s174_s22 + $0x8] sm:$0xff] %v386_v60  ;;  %v381_v2 = vadd.f32 %v380_v0, %v215_v47  ;;  %v306_v3 = vadd.f32 %v305_v1, %v211_v48  ;;  %v382_v4 = vpop.f32.mrb[3].mxu1 }
  0xef   : > { %397 = vst.msk [vmem:[%s174_s22 + $0x18] sm:$0xff] %vm396_vm1, %v388_v62  ;;  %v389_v5 = vmax.f32 %v304_v63, 0.0  ;;  %v383_v6 = vadd.f32 %v382_v4, %v219_v49 }
  0xf0   : > { %v391_v7 = vmax.f32 %v381_v2, 0.0  ;;  %v390_v8 = vmax.f32 %v306_v3, 0.0 }
  0xf1   : > { %398 = vst [vmem:[%s174_s22 + $0x20] sm:$0xff] %v389_v5  ;;  %v392_v9 = vmax.f32 %v383_v6, 0.0 }
  0xf2   : > { %400 = vst [vmem:[%s174_s22 + $0x30] sm:$0xff] %v391_v7  ;;  %399 = vst [vmem:[%s174_s22 + $0x28] sm:$0xff] %v390_v8 }
  0xf3   : > { %401 = vst.msk [vmem:[%s174_s22 + $0x38] sm:$0xff] %vm396_vm1, %v392_v9 }
  0xf4 PF: > { %s13_s12 = sadd.s32 1, %s516_s12  }
  0xf5   : > { %p10_p4 = scmp.ge.s32.totalorder %s13_s12, 4  }
  0xf7   :  { %12 = sbr.rel (!%p10_p4) target bundleno = 1 (0x1), region = 62 }

</bundles_post_ra>
